<compile_context>
chip_gen: v5e
topology: v5e:2x2
jax: 0.10.0
libtpu: 0.0.40
codegen_flags: <defaults>
</compile_context>

<pallas_src>
import functools

import numpy as np
import jax
import jax.numpy as jnp
from jax.experimental import pallas as pl
from jax.experimental.pallas import tpu as pltpu


# ----------------------------------------------------------------------------
# Parameter / matrix setup (host-side, float64, deterministic).
# ----------------------------------------------------------------------------
class Params:
    Faraday = 96485.33
    # anode
    D_s_n = 3.9e-14
    R_s_n = 2.0e-6
    a_s_n = 7.5e5
    A_n = 1.0
    L_n = 50.0e-6
    R_f_n = 1.0e-3
    k_n = 1.0e-5
    # cathode
    D_s_p = 1.0e-13
    R_s_p = 2.0e-6
    a_s_p = 7.5e5
    A_p = 1.0
    L_p = 36.0e-6
    k_p = 3.0e-6
    nLi_s = 2.5


def spm_fdm_matrices(n_r):
    """Finite-difference A (M,M) and B (M,) for spherical diffusion interior nodes."""
    M = n_r - 1
    A = np.zeros((M, M), dtype=np.float64)
    for i in range(M):
        q = i + 1.0  # radial node index, r = q * delta_r_bar
        if i > 0:
            A[i, i - 1] = (q - 1.0) / q
        A[i, i] = -2.0
        if i < M - 1:
            A[i, i + 1] = (q + 1.0) / q
    # surface node: ghost-node elimination of the Neumann flux BC
    A[M - 1, M - 2] = 2.0
    B = np.zeros((M,), dtype=np.float64)
    B[M - 1] = 2.0 * (M + 1.0) / M
    return A, B


def build_integrate_spm_mats(p, n_r):
    """Returns float64 numpy (matAn, matBn, matAp, matBp)."""
    delta_r_bar = 1.0 / n_r
    alpha = lambda D_s, R_s: D_s / (R_s * delta_r_bar) ** 2
    beta = lambda R_s, D_s, a_s, A, L: (
        2.0 * delta_r_bar * R_s / (D_s * p.Faraday * a_s * A * L)
    )
    alpha_n = alpha(p.D_s_n, p.R_s_n)
    alpha_p = alpha(p.D_s_p, p.R_s_p)
    beta_n = -beta(p.R_s_n, p.D_s_n, p.a_s_n, p.A_n, p.L_n)
    beta_p = beta(p.R_s_p, p.D_s_p, p.a_s_p, p.A_p, p.L_p)
    matA, matB = spm_fdm_matrices(n_r)
    matAn = alpha_n * matA
    matBn = alpha_n * beta_n * matB
    matAp = alpha_p * matA
    matBp = alpha_p * beta_p * matB
    return matAn, matBn, matAp, matBp


def rk4_transition(A, Bvec, h):
    """One RK4 step of dx/dt = A x + B u (u const over step) as x -> Phi x + Gam u."""
    A = np.asarray(A, np.float64)
    Bvec = np.asarray(Bvec, np.float64)
    M = A.shape[0]
    I = np.eye(M, dtype=np.float64)
    hA = h * A
    P = h * (I + hA / 2.0 + (hA @ hA) / 6.0 + (hA @ hA @ hA) / 24.0)
    Phi = I + P @ A
    Gam = P @ Bvec
    return Phi, Gam


def build_lifted_transition(Phi, Gam, s, mp2):
    """Lift s exact-RK4 steps into one affine map (float64 on host).

    Row-vector form:  [x_t (1,mp2)] @ Wx + [u_t..u_{t+s-1} (1,s)] @ Wu
                      = [x_{t+1}, ..., x_{t+s}]  flattened to (1, s*mp2).
    Phi/Gam are zero-padded from width 2M to mp2 (padded state stays zero).
    """
    M2 = Phi.shape[0]
    Phi_p = np.zeros((mp2, mp2), np.float64)
    Phi_p[:M2, :M2] = Phi
    Gam_p = np.zeros((mp2,), np.float64)
    Gam_p[:M2] = Gam
    powers = [np.eye(mp2, dtype=np.float64)]
    for _ in range(s):
        powers.append(powers[-1] @ Phi_p)
    Wx = np.zeros((mp2, s * mp2), np.float64)
    Wu = np.zeros((s, s * mp2), np.float64)
    for m in range(1, s + 1):
        Wx[:, (m - 1) * mp2 : m * mp2] = powers[m].T
        for r in range(m):
            Wu[r, (m - 1) * mp2 : m * mp2] = powers[m - 1 - r] @ Gam_p
    return Wx, Wu


# ----------------------------------------------------------------------------
# Pallas kernel: one grid step = G groups of s RK4 time steps (both electrodes
# fused block-diagonally into one transition).
# ----------------------------------------------------------------------------
def _spm_chunk_kernel(
    x0_ref, i_ref, wx_ref, wu_ref, out_ref, x_sc, *, groups, s_lift, mp2, unroll
):
    # Initialize the carried state from x on the first time chunk.
    @pl.when(pl.program_id(0) == 0)
    def _():
        x_sc[...] = x0_ref[...]

    wx = wx_ref[...]  # (mp2, s*mp2) lifted state transition
    wu = wu_ref[...]  # (s,   s*mp2) lifted input injection

    def body(g, x):
        u = i_ref[g]  # (B, s) currents for this group of s steps
        y = jnp.dot(
            x, wx,
            preferred_element_type=jnp.float32,
            precision=jax.lax.Precision.HIGHEST,
        ) + jnp.dot(
            u, wu,
            preferred_element_type=jnp.float32,
            precision=jax.lax.Precision.HIGHEST,
        )
        out_ref[g] = y                      # lane-dense (B, s*mp2) slab store
        return y[:, (s_lift - 1) * mp2 :]   # new carried state = last block

    x_sc[...] = jax.lax.fori_loop(0, groups, body, x_sc[...], unroll=unroll)


def integrate_spm_forward(
    x, i_seq, k, matAn, matBn, matAp, matBp, n_r, h, t_chunk=1024, s_lift=8
):
    """Pallas equivalent of IntegrateSPM.forward(x, i_seq, k) -> (B, 2M, k)."""
    B = x.shape[0]
    M = n_r - 1
    M2 = 2 * M
    assert x.shape[1] == M2 and i_seq.shape == (B, k)

    # Fused block-diagonal one-step RK4 transition (float64), then s-step lift.
    Phi_n, Gam_n = rk4_transition(matAn, matBn, float(h))
    Phi_p, Gam_p = rk4_transition(matAp, matBp, float(h))
    Phi = np.zeros((M2, M2), np.float64)
    Phi[:M, :M] = Phi_n
    Phi[M:, M:] = Phi_p
    Gam = np.concatenate([Gam_n, Gam_p])

    s = int(s_lift)
    mp2 = -(-M2 // 8) * 8                      # pad state width 14 -> 16
    Wx_np, Wu_np = build_lifted_transition(Phi, Gam, s, mp2)
    Wx = jnp.asarray(Wx_np, jnp.float32)       # (mp2, s*mp2) = (16, 128)
    Wu = jnp.asarray(Wu_np, jnp.float32)       # (s,   s*mp2) = (8, 128)

    # Time chunking: T steps (= G groups of s) per grid iteration.
    T = max(s, min(int(t_chunk), -(-k // s) * s))
    T = -(-T // s) * s
    num_chunks = -(-k // T)
    k_pad = num_chunks * T
    G = T // s
    G_total = k_pad // s

    # Current: (B, k) -> group-major (G_total, B, s); padded tail steps carry
    # zero current (outputs are sliced off below).
    i_pad = jnp.pad(i_seq.astype(jnp.float32), ((0, 0), (0, k_pad - k)))
    i_grp = jnp.transpose(i_pad.reshape(B, G_total, s), (1, 0, 2))

    # Initial state, zero-padded to mp2.
    x0 = jnp.pad(x.astype(jnp.float32), ((0, 0), (0, mp2 - M2)))

    unroll = (
        G if G <= 8 else (8 if G % 8 == 0 else (4 if G % 4 == 0 else
                          (2 if G % 2 == 0 else 1)))
    )

    out = pl.pallas_call(
        functools.partial(
            _spm_chunk_kernel, groups=G, s_lift=s, mp2=mp2, unroll=unroll
        ),
        out_shape=jax.ShapeDtypeStruct((G_total, B, s * mp2), jnp.float32),
        grid_spec=pltpu.PrefetchScalarGridSpec(
            num_scalar_prefetch=0,
            grid=(num_chunks,),
            in_specs=[
                pl.BlockSpec((B, mp2), lambda c: (0, 0)),            # x0
                pl.BlockSpec((G, B, s), lambda c: (c, 0, 0)),        # currents
                pl.BlockSpec((mp2, s * mp2), lambda c: (0, 0)),      # Wx
                pl.BlockSpec((s, s * mp2), lambda c: (0, 0)),        # Wu
            ],
            out_specs=pl.BlockSpec((G, B, s * mp2), lambda c: (c, 0, 0)),
            scratch_shapes=[pltpu.VMEM((B, mp2), jnp.float32)],      # carried x
        ),
        compiler_params=pltpu.CompilerParams(
            # Carried state lives in VMEM scratch -> the time-chunk axis MUST
            # stay sequential on one core ("arbitrary"); never "parallel".
            dimension_semantics=("arbitrary",),
        ),
    )(x0, i_grp, Wx, Wu)

    # (G_total, B, s*mp2) -> (B, 2M, k) matching the PyTorch output layout.
    out = out.reshape(G_total, B, s, mp2)
    out = jnp.transpose(out, (1, 3, 0, 2)).reshape(B, mp2, k_pad)
    return out[:, :M2, :k]


# ----------------------------------------------------------------------------
# Pure-numpy reference (matches the PyTorch forward semantics: explicit RK4).
# ----------------------------------------------------------------------------
def reference_forward(x, i_seq, k, matAn, matBn, matAp, matBp, n_r, h):
    M = n_r - 1
    xn = np.asarray(x[:, :M], np.float64)
    xp = np.asarray(x[:, M:], np.float64)
    An = np.asarray(matAn, np.float64)
    Bn = np.asarray(matBn, np.float64)
    Ap = np.asarray(matAp, np.float64)
    Bp = np.asarray(matBp, np.float64)
    i_seq = np.asarray(i_seq, np.float64)
    out = np.zeros((x.shape[0], 2 * M, k), np.float64)

    def f(x_, u, A, b):
        return x_ @ A.T + u * b[None, :]

    def rk4(x_, u, A, b):
        k1 = f(x_, u, A, b)
        k2 = f(x_ + 0.5 * h * k1, u, A, b)
        k3 = f(x_ + 0.5 * h * k2, u, A, b)
        k4 = f(x_ + h * k3, u, A, b)
        return x_ + (h / 6.0) * (k1 + 2 * k2 + 2 * k3 + k4)

    for j in range(k):
        u = i_seq[:, j : j + 1]
        xn = rk4(xn, u, An, Bn)
        xp = rk4(xp, u, Ap, Bp)
        out[:, :M, j] = xn
        out[:, M:, j] = xp
    return out


if __name__ == "__main__":
    p = Params()
    n_r = 8          # cfg['n_r']
    h = 0.1          # cfg['h']
    batch = 2
    M = n_r - 1

    matAn, matBn, matAp, matBp = build_integrate_spm_mats(p, n_r)

    key = jax.random.PRNGKey(0)
    kx, ki = jax.random.split(key)
    x = jax.random.uniform(kx, (batch, 2 * M), jnp.float32, 0.3, 0.7)
    k_max = 128
    i_full = jax.random.normal(ki, (batch, k_max), jnp.float32)

    # (k, t_chunk) cases: single chunk / multi-chunk carried state / padded
    # tail (k not a multiple of T) / larger chunk with G>1 and unroll.
    cases = [(8, 1024), (24, 8), (40, 16), (128, 1024)]
    for k_steps, t_chunk in cases:
        i_seq = i_full[:, :k_steps]
        ref = reference_forward(
            np.asarray(x), np.asarray(i_seq), k_steps,
            matAn, matBn, matAp, matBp, n_r, h,
        )
        x_all = integrate_spm_forward(
            x, i_seq, k_steps, matAn, matBn, matAp, matBp, n_r, h,
            t_chunk=t_chunk,
        )
        x_all = jax.block_until_ready(x_all)
        assert x_all.shape == (batch, 2 * M, k_steps)
        np.testing.assert_allclose(
            np.asarray(x_all), ref, rtol=1e-3, atol=1e-4,
            err_msg=f"mismatch for k={k_steps}, t_chunk={t_chunk}",
        )

    print("KERNEL_OK")
</pallas_src>

<mosaic_0001>
module attributes {stable_mosaic.version = 11 : i64} {
  func.func @_spm_chunk_kernel(%arg0: i32, %arg1: memref<2x16xf32, #tpu.memory_space<vmem>>, %arg2: memref<1x2x8xf32, #tpu.memory_space<vmem>>, %arg3: memref<16x128xf32, #tpu.memory_space<vmem>>, %arg4: memref<8x128xf32, #tpu.memory_space<vmem>>, %arg5: memref<1x2x128xf32, #tpu.memory_space<vmem>>, %arg6: memref<2x16xf32, #tpu.memory_space<vmem>>) attributes {dimension_semantics = [#tpu.dimension_semantics<arbitrary>], iteration_bounds = array<i64: 1>, scalar_prefetch = 0 : i64, scratch_operands = 1 : i64, tpu.core_type = #tpu.core_type<tc>, window_params = [{pipeline_mode = #tpu.pipeline_mode<synchronous>, transform_indices = @transform_0, window_bounds = array<i64: 2, 16>}, {transform_indices = @transform_1, window_bounds = array<i64: 1, 2, 8>}, {pipeline_mode = #tpu.pipeline_mode<synchronous>, transform_indices = @transform_2, window_bounds = array<i64: 16, 128>}, {pipeline_mode = #tpu.pipeline_mode<synchronous>, transform_indices = @transform_3, window_bounds = array<i64: 8, 128>}, {transform_indices = @transform_4, window_bounds = array<i64: 1, 2, 128>}]} {
    %c0_i32 = arith.constant 0 : i32
    %0 = arith.cmpi eq, %arg0, %c0_i32 : i32
    %1 = arith.extui %0 : i1 to i32
    %c0_i32_0 = arith.constant 0 : i32
    %2 = arith.cmpi ne, %1, %c0_i32_0 : i32
    scf.if %2 {
      %c0_14 = arith.constant 0 : index
      %c0_15 = arith.constant 0 : index
      %18 = vector.load %arg1[%c0_14, %c0_15] : memref<2x16xf32, #tpu.memory_space<vmem>>, vector<2x16xf32>
      %c0_16 = arith.constant 0 : index
      %c0_17 = arith.constant 0 : index
      %19 = vector.load %arg6[%c0_16, %c0_17] : memref<2x16xf32, #tpu.memory_space<vmem>>, vector<2x16xf32>
      tpu.vector_store %arg6[%c0_16, %c0_17], %18 {strides = array<i32>} : memref<2x16xf32, #tpu.memory_space<vmem>>, vector<2x16xf32>,
    } else {
    }
    %c0 = arith.constant 0 : index
    %c0_1 = arith.constant 0 : index
    %3 = vector.load %arg3[%c0, %c0_1] : memref<16x128xf32, #tpu.memory_space<vmem>>, vector<16x128xf32>
    %c0_2 = arith.constant 0 : index
    %c0_3 = arith.constant 0 : index
    %4 = vector.load %arg4[%c0_2, %c0_3] : memref<8x128xf32, #tpu.memory_space<vmem>>, vector<8x128xf32>
    %c0_4 = arith.constant 0 : index
    %c0_5 = arith.constant 0 : index
    %5 = vector.load %arg6[%c0_4, %c0_5] : memref<2x16xf32, #tpu.memory_space<vmem>>, vector<2x16xf32>
    %c0_i32_6 = arith.constant 0 : i32
    %6 = arith.index_cast %c0_i32_6 : i32 to index
    %c0_7 = arith.constant 0 : index
    %c0_8 = arith.constant 0 : index
    %7 = vector.load %arg2[%6, %c0_7, %c0_8] : memref<1x2x8xf32, #tpu.memory_space<vmem>>, vector<1x2x8xf32>
    %8 = vector.shape_cast %7 : vector<1x2x8xf32> to vector<2x8xf32>
    %cst = arith.constant dense<0.000000e+00> : vector<2x128xf32>
    %9 = tpu.matmul %5, %3, %cst {dimension_numbers = #tpu.dot_dimension_numbers<[1], [0], [0], [1], [0, 0, 1, 1], [], []>, precision = #tpu.contract_precision<fp32>} : vector<2x16xf32>, vector<16x128xf32>, vector<2x128xf32> -> vector<2x128xf32>
    %cst_9 = arith.constant dense<0.000000e+00> : vector<2x128xf32>
    %10 = tpu.matmul %8, %4, %cst_9 {dimension_numbers = #tpu.dot_dimension_numbers<[1], [0], [0], [1], [0, 0, 1, 1], [], []>, precision = #tpu.contract_precision<fp32>} : vector<2x8xf32>, vector<8x128xf32>, vector<2x128xf32> -> vector<2x128xf32>
    %11 = arith.addf %9, %10 : vector<2x128xf32>
    %12 = arith.index_cast %c0_i32_6 : i32 to index
    %c0_10 = arith.constant 0 : index
    %c0_11 = arith.constant 0 : index
    %13 = vector.load %arg5[%12, %c0_10, %c0_11] : memref<1x2x128xf32, #tpu.memory_space<vmem>>, vector<1x2x128xf32>
    %14 = vector.shape_cast %13 : vector<1x2x128xf32> to vector<2x128xf32>
    %15 = vector.shape_cast %11 : vector<2x128xf32> to vector<1x2x128xf32>
    tpu.vector_store %arg5[%12, %c0_10, %c0_11], %15 {strides = array<i32>} : memref<1x2x128xf32, #tpu.memory_space<vmem>>, vector<1x2x128xf32>,
    %16 = vector.extract_strided_slice %11 {offsets = [0, 112], sizes = [2, 16], strides = [1, 1]} : vector<2x128xf32> to vector<2x16xf32>
    %c1_i32 = arith.constant 1 : i32
    %c0_12 = arith.constant 0 : index
    %c0_13 = arith.constant 0 : index
    %17 = vector.load %arg6[%c0_12, %c0_13] : memref<2x16xf32, #tpu.memory_space<vmem>>, vector<2x16xf32>
    tpu.vector_store %arg6[%c0_12, %c0_13], %16 {strides = array<i32>} : memref<2x16xf32, #tpu.memory_space<vmem>>, vector<2x16xf32>,
    return
  }
  func.func @transform_0(%arg0: i32) -> (i32, i32) {
    %c0_i32 = arith.constant 0 : i32
    %c0_i32_0 = arith.constant 0 : i32
    %c0_i32_1 = arith.constant 0 : i32
    return %c0_i32, %c0_i32_0 : i32, i32
  }
  func.func @transform_1(%arg0: i32) -> (i32, i32, i32) {
    %c0_i32 = arith.constant 0 : i32
    %c0_i32_0 = arith.constant 0 : i32
    %c0_i32_1 = arith.constant 0 : i32
    return %arg0, %c0_i32, %c0_i32_0 : i32, i32, i32
  }
  func.func @transform_2(%arg0: i32) -> (i32, i32) {
    %c0_i32 = arith.constant 0 : i32
    %c0_i32_0 = arith.constant 0 : i32
    %c0_i32_1 = arith.constant 0 : i32
    return %c0_i32, %c0_i32_0 : i32, i32
  }
  func.func @transform_3(%arg0: i32) -> (i32, i32) {
    %c0_i32 = arith.constant 0 : i32
    %c0_i32_0 = arith.constant 0 : i32
    %c0_i32_1 = arith.constant 0 : i32
    return %c0_i32, %c0_i32_0 : i32, i32
  }
  func.func @transform_4(%arg0: i32) -> (i32, i32, i32) {
    %c0_i32 = arith.constant 0 : i32
    %c0_i32_0 = arith.constant 0 : i32
    %c0_i32_1 = arith.constant 0 : i32
    return %arg0, %c0_i32, %c0_i32_0 : i32, i32, i32
  }
}

</mosaic_0001>

<bundles_post_ra>
// kernel: tpu_custom_call.1
= control target key start
LH: loop header
LB: loop body
LE: loop exit
PB: predicated region body
PF: predicated region fallthrough
CT: control target
= control target key end

     0   :  { %9 = vsyncpa [#allocation4], 0  ;;  %s612_s0 = inlined_call_operand.hbm [shape: f32[2,16], index: 0, kind: input, shape index: {}]   ;;  %s613_s1 = inlined_call_operand.hbm [shape: f32[1,2,8], index: 1, kind: input, shape index: {}]   ;;  %s614_s2 = inlined_call_operand.hbm [shape: f32[16,128], index: 2, kind: input, shape index: {}]   ;;  %s615_s3 = inlined_call_operand.hbm [shape: f32[8,128], index: 3, kind: input, shape index: {}]   ;;  %s616_s4 = inlined_call_operand.hbm [shape: f32[1,2,128], index: 4, kind: output, shape index: {}]  }
   0x1   :  { %10 = vsyncpa [#allocation7], 0 }
   0x2   :  { %11 = vsyncpa [#allocation10], 0  ;;  %s29_s17 = sshll.u32 %s613_s1, 4  ;;  %s30_s17 = int_to_ptr.hbm [resolvable:$true] %s29_s17 }
   0x3   :  { %12 = vsyncpa [#allocation5], 0  ;;  %s562_s18 = smov [#allocation6]   ;;  %s18_s22 = sshll.u32 %s612_s0, 4  ;;  %s19_s22 = int_to_ptr.hbm [resolvable:$true] %s18_s22 }
   0x4   :  { %s31_s19 = sshll.u32 %s562_s18, 4  ;;  %s563_s23 = smov [#allocation3]   ;;  %s32_s19 = int_to_ptr.vmem [resolvable:$true] %s31_s19 }
   0x5   :  { %34 = dma.hbm_to_vmem [thread:$0]  %s30_s17, 32, %s32_s19, [#allocation7]  }
   0x6   :  { %s20_s24 = sshll.u32 %s563_s23, 4  ;;  %s39_s27 = sshll.u32 %s614_s2, 4  ;;  %s21_s24 = int_to_ptr.vmem [resolvable:$true] %s20_s24  ;;  %s40_s27 = int_to_ptr.hbm [resolvable:$true] %s39_s27 }
   0x7   :  { %23 = dma.hbm_to_vmem [thread:$0]  %s19_s22, 32, %s21_s24, [#allocation4]  }
   0x8   :  { %s564_s1 = smov [#allocation8]   ;;  %s53_s5 = sshll.u32 %s615_s3, 4  ;;  %s54_s5 = int_to_ptr.hbm [resolvable:$true] %s53_s5 }
   0x9   :  { %s41_s28 = sshll.u32 %s564_s1, 4  ;;  %s565_s6 = smov 128   ;;  %s42_s28 = int_to_ptr.vmem [resolvable:$true] %s41_s28 }
   0xa   :  { %s566_s0 = smov 8   ;;  %s567_s7 = smov [#allocation9]  }
   0xb   :  { %47 = dma.hbm_to_vmem [thread:$0]  %s40_s27, 256, %s42_s28, [#allocation7], %s565_s6, %s565_s6, %s566_s0  }
   0xc   :  { %s55_s8 = sshll.u32 %s567_s7, 4  ;;  %s56_s8 = int_to_ptr.vmem [resolvable:$true] %s55_s8 }
   0xd   :  { %58 = dma.hbm_to_vmem [thread:$0]  %s54_s5, 128, %s56_s8, [#allocation10]  }
   0xe   :  { %554 = dma.done.wait [#allocation4], 32  }
   0xf   :  { %555 = vsyncadd [#allocation4], 4294967264 }
  0x10   :  { %556 = dma.done.wait [#allocation7], 288  }
  0x11   :  { %557 = vsyncadd [#allocation7], 4294967008 }
  0x12   :  { %558 = dma.done.wait [#allocation10], 128  }
  0x13   :  { %559 = vsyncadd [#allocation10], 4294967168  ;;  %vm80_vm0 = vcmask 123904   ;;  %vm87_vm1 = vcmask 64512   ;;  %v79_v0 = vld [vmem:[#allocation3] sm:$0x3] }
  0x14   :  { %v84_v1 = vld [vmem:[#allocation9] sm:$0xff]  ;;  %v86_v2 = vld [vmem:[#allocation6] sm:$0x3]  ;;  %81 = vst.msk [vmem:[#allocation2] sm:$0x3] %vm80_vm0, %v79_v0  ;;  %v83_v5 = vld [vmem:[#allocation8 + $0x8] sm:$0xff] }
  0x15   :  { %v106_v3 = vand.u32 4294901760, %v84_v1  ;;  %v89_v4 = vsel %vm87_vm1, %v86_v2, 0  ;;  %v82_v6 = vld [vmem:[#allocation8] sm:$0xff]  ;;  %v255_v8 = vand.u32 4294901760, %v83_v5  ;;  %vm237_vm2 = vcmask 130048   ;;  %s568_s2 = smov [#allocation11]  }
  0x16   :  { %v108_v7 = vand.u32 4294901760, %v89_v4  ;;  %v257_v9 = vand.u32 4294901760, %v82_v6  ;;  %s412_s3 = sshll.u32 %s568_s2, 4  ;;  %s414_s11 = sshll.u32 %s616_s4, 4  ;;  %s413_s3 = int_to_ptr.vmem [resolvable:$true] %s412_s3  ;;  %s415_s11 = int_to_ptr.hbm [resolvable:$true] %s414_s11 }
  0x17   :  { %v133_v10 = vsub.f32 %v84_v1, %v106_v3  ;;  %107 = vmatpush.msra.mxu0 %v106_v3  ;;  %183 = vmatpush.msra.mxu3 %v106_v3  ;;  %v283_v12 = vsub.f32 %v83_v5, %v255_v8  ;;  %s569_s12 = smov 16  }
  0x18   :  { %v109_v11 = vsub.f32 %v89_v4, %v108_v7  ;;  %v289_v13 = vsub.f32 %v82_v6, %v257_v9 }
  0x19   :  { %160 = vmatpush.msra.mxu2 %v133_v10  ;;  %v134_v14 = vand.u32 4294901760, %v133_v10  ;;  %v284_v16 = vand.u32 4294901760, %v283_v12 }
  0x1a   :  { %163 = vmatmul.f32.vlgmr.msra.gmra.mxu2 %v109_v11  ;;  %v110_v15 = vand.u32 4294901760, %v109_v11  ;;  %v290_v17 = vand.u32 4294901760, %v289_v13 }
  0x1b   :  { %256 = vmatpush.msrb.mxu2 %v255_v8  ;;  %v135_v18 = vsub.f32 %v133_v10, %v134_v14  ;;  %209 = vmatpush.msrb.mxu0 %v134_v14  ;;  %v285_v20 = vsub.f32 %v283_v12, %v284_v16  ;;  %v85_v22 = vld [vmem:[#allocation2] sm:$0x3] }
  0x1c   :  { %v111_v19 = vsub.f32 %v109_v11, %v110_v15  ;;  %187 = vmatmul.f32.vlgmr.msra.gmra.mxu3 %v110_v15  ;;  %v291_v21 = vsub.f32 %v289_v13, %v290_v17  ;;  %v239_v24 = vsel %vm237_vm2, %v85_v22, 0 }
  0x1d   :  { %v136_v23 = vand.u32 4294901760, %v135_v18  ;;  %258 = vmatpush.msrb.mxu2 %v257_v9  ;;  %v286_v26 = vand.u32 4294901760, %v285_v20  ;;  %v259_v27 = vand.u32 4294901760, %v239_v24 }
  0x1e   :  { %v112_v25 = vand.u32 4294901760, %v111_v19  ;;  %v292_v28 = vand.u32 4294901760, %v291_v21 }
  0x1f   :  { %367 = vmatpush.msra.mxu2 %v284_v16  ;;  %137 = vmatpush.msra.mxu1 %v136_v23  ;;  %v260_v29 = vsub.f32 %v239_v24, %v259_v27 }
  0x20   :  { %113 = vmatmul.f32.vlgmr.msra.gmra.mxu0 %v112_v25  ;;  %139 = vmatmul.f32.vlgmr.msra.gmra.mxu1 %v108_v7 }
  0x21   :  { %287 = vmatpush.msrb.mxu3 %v286_v26  ;;  %231 = vmatpush.msrb.mxu1 %v106_v3  ;;  %v261_v30 = vand.u32 4294901760, %v260_v29 }
  0x22   :  { %315 = vmatpush.msra.mxu0 %v283_v12  ;;  %371 = vmatpush.msra.mxu2 %v290_v17 }
  0x23   :  { %340 = vmatpush.msra.mxu1 %v255_v8  ;;  %293 = vmatpush.msrb.mxu3 %v292_v28  ;;  %v262_v31 = vsub.f32 %v260_v29, %v261_v30 }
  0x24   :  { %295 = vmatmul.f32.vlgmr.msrb.gmra.mxu3 %v259_v27  ;;  %318 = vmatpush.msra.mxu0 %v289_v13 }
  0x25   :  { %392 = vmatpush.msra.mxu3 %v255_v8  ;;  %342 = vmatpush.msra.mxu1 %v257_v9  ;;  %v263_v32 = vand.u32 4294901760, %v262_v31 }
  0x27   :  { %394 = vmatpush.msra.mxu3 %v257_v9  ;;  %264 = vmatmul.f32.vlgmr.msrb.gmra.mxu2 %v263_v32 }
  0x28   :  { %211 = vmatmul.f32.vlgmr.msrb.gmra.mxu0 %v108_v7  ;;  %233 = vmatmul.f32.vlgmr.msrb.gmra.mxu1 %v108_v7 }
  0x2c   :  { %396 = vmatmul.f32.vlgmr.msra.gmra.mxu3 %v259_v27 }
  0x2f   :  { %373 = vmatmul.f32.vlgmr.msra.gmra.mxu2 %v259_v27 }
  0x30   :  { %321 = vmatmul.f32.vlgmr.msra.gmra.mxu0 %v260_v29  ;;  %346 = vmatmul.f32.vlgmr.msra.gmra.mxu1 %v261_v30 }
  0x9d   :  { %v114_v33 = vpop.f32.mrf.mxu0  ;;  %v140_v34 = vpop.f32.mrf.mxu1 }
  0x9e   :  { %v141_v35 = vadd.f32 %v140_v34, %v114_v33  ;;  %v164_v36 = vpop.f32.mrf.mxu2 }
  0x9f   :  { %v188_v37 = vpop.f32.mrf.mxu3 }
  0xa0   :  { %v165_v38 = vadd.f32 %v164_v36, %v141_v35 }
  0xa2   :  { %v189_v39 = vadd.f32 %v188_v37, %v165_v38 }
  0xa5   :  { %v212_v40 = vpop.f32.mrf.mxu0  ;;  %v234_v42 = vpop.f32.mrf.mxu1 }
  0xa6   :  { %v213_v41 = vadd.f32 %v212_v40, %v189_v39 }
  0xa7   :  { %v296_v43 = vpop.f32.mrf.mxu3 }
  0xa8   :  { %v235_v44 = vadd.f32 %v234_v42, %v213_v41 }
  0xaa   :  { %v265_v45 = vpop.f32.mrf.mxu2 }
  0xab   :  { %v266_v46 = vadd.f32 %v265_v45, %v235_v44 }
  0xad   :  { %v322_v47 = vpop.f32.mrf.mxu0  ;;  %v297_v48 = vadd.f32 %v296_v43, %v266_v46  ;;  %v347_v49 = vpop.f32.mrf.mxu1 }
  0xaf   :  { %v323_v50 = vadd.f32 %v322_v47, %v297_v48  ;;  %v397_v53 = vpop.f32.mrf.mxu3 }
  0xb1   :  { %v348_v51 = vadd.f32 %v347_v49, %v323_v50 }
  0xb2   :  { %v374_v52 = vpop.f32.mrf.mxu2 }
  0xb3   :  { %v375_v54 = vadd.f32 %v374_v52, %v348_v51 }
  0xb5   :  { %v398_v55 = vadd.f32 %v397_v53, %v375_v54 }
  0xb7   :  { %400 = vst [vmem:[#allocation11] sm:$0x3] %v398_v55  ;;  %402 = vrot.lane.b32.xlu0 %v398_v55, %s569_s12 }
  0xb8   :  { %417 = dma.vmem_to_hbm [thread:$0]  %s413_s3, 32, %s415_s11, [#allocation5]  }
 0x129   :  { %v403_v56 = vpop.permute.xlu0 %402 }
 0x12a   :  { %406 = vst.msk [vmem:[#allocation2] sm:$0x3] %vm80_vm0, %v403_v56 }
 0x12b   :  { %560 = dma.done.wait [#allocation5], 32  }
 0x12c   :  { %561 = vsyncadd [#allocation5], 4294967264 }
 0x12d   :  { %422 = vsyncpa [#allocation4], 1 }
 0x12e   :  { %423 = vsyncpa [#allocation7], 1 }
 0x12f   :  { %424 = vsyncpa [#allocation10], 1 }
 0x130   :  { %425 = vsyncpa [#allocation5], 1 }

</bundles_post_ra>
